<compile_context>
chip_gen: v5e
topology: v5e:2x2
jax: 0.10.0
libtpu: 0.0.40
codegen_flags: <defaults>
</compile_context>

<pallas_src>
import functools

import jax
import jax.numpy as jnp
from jax.experimental import pallas as pl
from jax.experimental.pallas import tpu as pltpu


# ---------------------------------------------------------------------------
# Kernel
# ---------------------------------------------------------------------------
def _projection_kernel(x_ref, w1_ref, w2_ref, o_ref, acc_ref, *, inv_seq_len):
    # x_ref:  (TB, TS, Dk)    current (lane-folded) sequence tile of x
    # w1_ref: (Dk, O_pad)     resident, vertically tiled if lane-folded
    # w2_ref: (O_pad, O_pad)  resident
    # o_ref:  (TB, O_pad)     written only on the last sequence step
    # acc_ref:(TB, Dk) f32    running sum of x over the (folded) sequence axis
    s = pl.program_id(1)

    @pl.when(s == 0)
    def _zero():
        acc_ref[...] = jnp.zeros_like(acc_ref)

    # Per-tile sequence reduction, accumulated in f32 across grid steps.
    acc_ref[...] += jnp.sum(x_ref[...].astype(jnp.float32), axis=1)

    @pl.when(s == pl.num_programs(1) - 1)
    def _finalize():
        # Exact f32 mean (one VPU multiply on a (TB, Dk) tile).
        xm = (acc_ref[...] * inv_seq_len).astype(w1_ref.dtype)
        h = jnp.dot(xm, w1_ref[...], preferred_element_type=jnp.float32)
        h = jnp.maximum(h, 0.0)                                  # ReLU (VPU)
        out = jnp.dot(h.astype(w2_ref.dtype), w2_ref[...],
                      preferred_element_type=jnp.float32)
        o_ref[...] = out.astype(o_ref.dtype)


# ---------------------------------------------------------------------------
# Helpers
# ---------------------------------------------------------------------------
def _round_up(x: int, m: int) -> int:
    return ((x + m - 1) // m) * m


def _vmem_capacity_bytes() -> int:
    try:
        return int(pltpu.get_tpu_info().vmem_capacity_bytes)
    except Exception:
        return 64 * 1024 * 1024   # conservative: v7x has 64 MiB per TensorCore


def _fold_factor(d: int, seq_len: int) -> int:
    """Lane-folding factor k: (S, D) -> (S/k, k*D) so x blocks are 128-lane
    dense when D < 128. Requires D | 128 and k | S; otherwise k collapses."""
    if d >= 128 or 128 % d != 0:
        return 1
    k = 128 // d
    while k > 1 and seq_len % k != 0:
        k //= 2
    return k


def prepare_projection_weights(w1, w2, seq_len):
    """One-time weight preprocessing (hoisted out of the forward path):
      * zero-pad the output dim to a multiple of 128 (lane-dense stores and
        full MXU lanes); padded rows/cols contribute exactly zero,
      * if D < 128, vertically tile w1 k = 128//D times so the kernel can keep
        x in the lane-folded (B, S/k, k*D) layout and still compute mean(x)@w1.
    The 1/seq_len mean scale is applied inside the kernel in f32 (no weight
    rescale / rounding here)."""
    D, O = w1.shape
    assert w2.shape == (O, O)
    k = _fold_factor(D, seq_len)
    O_pad = _round_up(O, 128)
    w1_eff = jnp.tile(w1, (k, 1)) if k > 1 else w1              # (k*D, O)
    w1_p = jnp.pad(w1_eff, ((0, 0), (0, O_pad - O)))
    w2_p = jnp.pad(w2, ((0, O_pad - O), (0, O_pad - O)))
    return w1_p, w2_p, k, O


# ---------------------------------------------------------------------------
# Forward
# ---------------------------------------------------------------------------
def projection_forward(x, w1_p, w2_p, fold_k, out_dim, *,
                       block_b=None, block_s=None):
    """x: (B, S, D); w1_p: (fold_k*D, O_pad); w2_p: (O_pad, O_pad) -> (B, out_dim)

    Weights must come from prepare_projection_weights (already transposed to
    (in, out), padded, and tiled for the lane fold)."""
    B, S, D = x.shape
    Dk = fold_k * D
    O_pad = w1_p.shape[1]
    assert w1_p.shape == (Dk, O_pad) and w2_p.shape == (O_pad, O_pad)
    assert S % fold_k == 0

    x_item = jnp.dtype(x.dtype).itemsize
    w_item = jnp.dtype(w1_p.dtype).itemsize

    # Lane fold: (B, S, D) -> (B, S/k, k*D). The tiled w1 undoes it exactly.
    S_r = S // fold_k
    x_r = x.reshape(B, S_r, Dk) if fold_k > 1 else x

    # ---- batch tile --------------------------------------------------------
    # Sublane alignment: 8 rows (f32), 16 (bf16), 32 (int8/fp8).
    align_b = max(8, 32 // x_item)
    if block_b is not None:
        tb = _round_up(block_b, align_b)
    else:
        tb = min(_round_up(B, align_b), 256)
        # v7x megacore: keep >=2 "parallel" steps, but only when each half
        # still fills >=128 MXU rows. (For tiny B a per-core sequence split
        # would be needed instead; not worth it at these sizes.)
        if (_round_up(B, tb) // tb == 1 and tb >= 256
                and (tb // 2) % align_b == 0):
            tb //= 2
    B_pad = _round_up(B, tb)

    # ---- VMEM budget & sequence tile ---------------------------------------
    capacity = _vmem_capacity_bytes()
    weights_bytes = (Dk * O_pad + O_pad * O_pad) * w_item        # single-buffered
    fixed_bytes = weights_bytes + 2 * tb * O_pad * x_item + tb * Dk * 4
    # The double-buffered x stream gets the remaining budget, capped at about
    # capacity/4 (~32 MiB on 128 MiB chips, ~16 MiB on v7x's 64 MiB).
    x_allow = max(2 * tb * 8 * Dk * x_item,
                  min(int(0.65 * capacity) - fixed_bytes, capacity // 4))
    ts_max = max(8, x_allow // max(1, 2 * tb * Dk * x_item))
    if block_s is not None:
        ts = block_s
    elif S_r <= ts_max:
        ts = S_r
    else:
        ts = max(8, (ts_max // 8) * 8)
    # Zero-pad the folded sequence axis up to a tile multiple: exact for the
    # sum (mean uses the original S), and keeps the VMEM budget honest for
    # awkward (e.g. prime-ish) sequence lengths.
    S_r_pad = _round_up(S_r, ts)

    pad_b, pad_s = B_pad - B, S_r_pad - S_r
    if pad_b or pad_s:
        x_r = jnp.pad(x_r, ((0, pad_b), (0, pad_s), (0, 0)))

    grid = (B_pad // tb, S_r_pad // ts)

    def _vmem_need(weight_bufs):
        return (2 * tb * ts * Dk * x_item                          # x (double-buffered)
                + weight_bufs * (Dk * O_pad + O_pad * O_pad) * w_item
                + 2 * tb * O_pad * x_item                          # output
                + tb * Dk * 4)                                     # f32 accumulator

    kernel = functools.partial(_projection_kernel, inv_seq_len=1.0 / S)

    def _call(single_buffer_weights):
        # Constant index_map => the weights are DMA'd once; Buffered(1) drops
        # the useless second buffer (halves resident-weight VMEM).
        w_mode = ({"pipeline_mode": pl.Buffered(1)}
                  if single_buffer_weights else {})
        need = _vmem_need(1 if single_buffer_weights else 2)
        vmem_limit = int(min(max(1.3 * need, 16 * 1024 * 1024),
                             0.9 * capacity))
        return pl.pallas_call(
            kernel,
            out_shape=jax.ShapeDtypeStruct((B_pad, O_pad), x.dtype),
            grid=grid,
            in_specs=[
                pl.BlockSpec((tb, ts, Dk), lambda b, s: (b, s, 0)),       # x: pipelined over S
                pl.BlockSpec((Dk, O_pad), lambda b, s: (0, 0), **w_mode),  # w1: resident
                pl.BlockSpec((O_pad, O_pad), lambda b, s: (0, 0), **w_mode),  # w2: resident
            ],
            out_specs=pl.BlockSpec((tb, O_pad), lambda b, s: (b, 0)),
            scratch_shapes=[pltpu.VMEM((tb, Dk), jnp.float32)],
            compiler_params=pltpu.CompilerParams(
                dimension_semantics=("parallel", "arbitrary"),
                vmem_limit_bytes=vmem_limit,
            ),
        )(x_r, w1_p, w2_p)

    try:
        out_padded = _call(True)
    except Exception:
        # Fallback for JAX versions without BlockSpec pipeline_mode support.
        out_padded = _call(False)

    return out_padded[:B, :out_dim]


# ---------------------------------------------------------------------------
# Demo / correctness check
# ---------------------------------------------------------------------------
if __name__ == "__main__":
    B, S, D, O = 16, 64, 32, 32  # batch, seq, input_dim, output_dim

    key = jax.random.PRNGKey(0)
    kx, k1, k2 = jax.random.split(key, 3)

    x = jax.random.normal(kx, (B, S, D), dtype=jnp.float32)
    # nn.Linear weights are (out, in); stored transposed as (in, out) so the
    # kernel computes plain x @ W (same math as the bias-free Linears).
    w1 = jax.random.normal(k1, (D, O), dtype=jnp.float32) / jnp.sqrt(D)
    w2 = jax.random.normal(k2, (O, O), dtype=jnp.float32) / jnp.sqrt(O)

    # One-time weight prep (pad + lane-fold tiling), reused across calls.
    w1_p, w2_p, fold_k, out_dim = prepare_projection_weights(w1, w2, seq_len=S)
    w1_p, w2_p = jax.block_until_ready((w1_p, w2_p))

    out = projection_forward(x, w1_p, w2_p, fold_k, out_dim)
    out = jax.block_until_ready(out)

    # Pure-JAX reference of the PyTorch semantics: mean over seq, proj, relu, proj.
    xm = jnp.mean(x, axis=1)
    ref = jnp.maximum(xm @ w1, 0.0) @ w2
    assert out.shape == (B, O)
    max_err = float(jnp.max(jnp.abs(out - ref)))
    assert jnp.allclose(out, ref, atol=1e-5, rtol=1e-5), max_err

    print("KERNEL_OK")
</pallas_src>

<mosaic_0001>
module attributes {stable_mosaic.version = 11 : i64} {
  func.func @_projection_kernel(%arg0: i32, %arg1: i32, %arg2: memref<16x16x128xf32, #tpu.memory_space<vmem>>, %arg3: memref<128x128xf32, #tpu.memory_space<vmem>>, %arg4: memref<128x128xf32, #tpu.memory_space<vmem>>, %arg5: memref<16x128xf32, #tpu.memory_space<vmem>>, %arg6: memref<16x128xf32, #tpu.memory_space<vmem>>) attributes {dimension_semantics = [#tpu.dimension_semantics<parallel>, #tpu.dimension_semantics<arbitrary>], iteration_bounds = array<i64: 1, 1>, scalar_prefetch = 0 : i64, scratch_operands = 1 : i64, tpu.core_type = #tpu.core_type<tc>, window_params = [{transform_indices = @transform_0, window_bounds = array<i64: 16, 16, 128>}, {pipeline_mode = #tpu.pipeline_mode<synchronous>, transform_indices = @transform_1, window_bounds = array<i64: 128, 128>}, {pipeline_mode = #tpu.pipeline_mode<synchronous>, transform_indices = @transform_2, window_bounds = array<i64: 128, 128>}, {transform_indices = @transform_3, window_bounds = array<i64: 16, 128>}]} {
    %c0_i32 = arith.constant 0 : i32
    %0 = arith.cmpi eq, %arg1, %c0_i32 : i32
    %1 = arith.extui %0 : i1 to i32
    %c0_i32_0 = arith.constant 0 : i32
    %2 = arith.cmpi ne, %1, %c0_i32_0 : i32
    scf.if %2 {
      %cst_9 = arith.constant 0.000000e+00 : f32
      %11 = vector.broadcast %cst_9 : f32 to vector<16x128xf32>
      %c0_10 = arith.constant 0 : index
      %c0_11 = arith.constant 0 : index
      %12 = vector.load %arg6[%c0_10, %c0_11] : memref<16x128xf32, #tpu.memory_space<vmem>>, vector<16x128xf32>
      tpu.vector_store %arg6[%c0_10, %c0_11], %11 {strides = array<i32>} : memref<16x128xf32, #tpu.memory_space<vmem>>, vector<16x128xf32>,
    } else {
    }
    %c0 = arith.constant 0 : index
    %c0_1 = arith.constant 0 : index
    %3 = vector.load %arg6[%c0, %c0_1] : memref<16x128xf32, #tpu.memory_space<vmem>>, vector<16x128xf32>
    %c0_2 = arith.constant 0 : index
    %c0_3 = arith.constant 0 : index
    %c0_4 = arith.constant 0 : index
    %4 = vector.load %arg2[%c0_2, %c0_3, %c0_4] : memref<16x16x128xf32, #tpu.memory_space<vmem>>, vector<16x16x128xf32>
    %cst = arith.constant dense<0.000000e+00> : vector<16x128xf32>
    %5 = vector.multi_reduction <add>, %4, %cst [1] : vector<16x16x128xf32> to vector<16x128xf32>
    %6 = arith.addf %3, %5 : vector<16x128xf32>
    %c0_5 = arith.constant 0 : index
    %c0_6 = arith.constant 0 : index
    %7 = vector.load %arg6[%c0_5, %c0_6] : memref<16x128xf32, #tpu.memory_space<vmem>>, vector<16x128xf32>
    tpu.vector_store %arg6[%c0_5, %c0_6], %6 {strides = array<i32>} : memref<16x128xf32, #tpu.memory_space<vmem>>, vector<16x128xf32>,
    %c0_i32_7 = arith.constant 0 : i32
    %8 = arith.cmpi eq, %arg1, %c0_i32_7 : i32
    %9 = arith.extui %8 : i1 to i32
    %c0_i32_8 = arith.constant 0 : i32
    %10 = arith.cmpi ne, %9, %c0_i32_8 : i32
    scf.if %10 {
      %c0_9 = arith.constant 0 : index
      %c0_10 = arith.constant 0 : index
      %11 = vector.load %arg6[%c0_9, %c0_10] : memref<16x128xf32, #tpu.memory_space<vmem>>, vector<16x128xf32>
      %cst_11 = arith.constant 1.562500e-02 : f32
      %12 = vector.broadcast %cst_11 : f32 to vector<16x128xf32>
      %13 = arith.mulf %11, %12 : vector<16x128xf32>
      %c0_12 = arith.constant 0 : index
      %c0_13 = arith.constant 0 : index
      %14 = vector.load %arg3[%c0_12, %c0_13] : memref<128x128xf32, #tpu.memory_space<vmem>>, vector<128x128xf32>
      %cst_14 = arith.constant dense<0.000000e+00> : vector<16x128xf32>
      %15 = tpu.matmul %13, %14, %cst_14 {dimension_numbers = #tpu.dot_dimension_numbers<[1], [0], [0], [1], [0, 0, 1, 1], [], []>} : vector<16x128xf32>, vector<128x128xf32>, vector<16x128xf32> -> vector<16x128xf32>
      %cst_15 = arith.constant 0.000000e+00 : f32
      %16 = vector.broadcast %cst_15 : f32 to vector<16x128xf32>
      %17 = arith.maximumf %15, %16 : vector<16x128xf32>
      %c0_16 = arith.constant 0 : index
      %c0_17 = arith.constant 0 : index
      %18 = vector.load %arg4[%c0_16, %c0_17] : memref<128x128xf32, #tpu.memory_space<vmem>>, vector<128x128xf32>
      %cst_18 = arith.constant dense<0.000000e+00> : vector<16x128xf32>
      %19 = tpu.matmul %17, %18, %cst_18 {dimension_numbers = #tpu.dot_dimension_numbers<[1], [0], [0], [1], [0, 0, 1, 1], [], []>} : vector<16x128xf32>, vector<128x128xf32>, vector<16x128xf32> -> vector<16x128xf32>
      %c0_19 = arith.constant 0 : index
      %c0_20 = arith.constant 0 : index
      %20 = vector.load %arg5[%c0_19, %c0_20] : memref<16x128xf32, #tpu.memory_space<vmem>>, vector<16x128xf32>
      tpu.vector_store %arg5[%c0_19, %c0_20], %19 {strides = array<i32>} : memref<16x128xf32, #tpu.memory_space<vmem>>, vector<16x128xf32>,
    } else {
    }
    return
  }
  func.func @transform_0(%arg0: i32, %arg1: i32) -> (i32, i32, i32) {
    %c0_i32 = arith.constant 0 : i32
    %c0_i32_0 = arith.constant 0 : i32
    return %arg0, %arg1, %c0_i32 : i32, i32, i32
  }
  func.func @transform_1(%arg0: i32, %arg1: i32) -> (i32, i32) {
    %c0_i32 = arith.constant 0 : i32
    %c0_i32_0 = arith.constant 0 : i32
    %c0_i32_1 = arith.constant 0 : i32
    return %c0_i32, %c0_i32_0 : i32, i32
  }
  func.func @transform_2(%arg0: i32, %arg1: i32) -> (i32, i32) {
    %c0_i32 = arith.constant 0 : i32
    %c0_i32_0 = arith.constant 0 : i32
    %c0_i32_1 = arith.constant 0 : i32
    return %c0_i32, %c0_i32_0 : i32, i32
  }
  func.func @transform_3(%arg0: i32, %arg1: i32) -> (i32, i32) {
    %c0_i32 = arith.constant 0 : i32
    %c0_i32_0 = arith.constant 0 : i32
    return %arg0, %c0_i32 : i32, i32
  }
}

module attributes {stable_mosaic.version = 11 : i64} {
  func.func @_projection_kernel(%arg0: i32, %arg1: i32, %arg2: memref<16x16x128xf32, #tpu.memory_space<vmem>>, %arg3: memref<128x128xf32, #tpu.memory_space<vmem>>, %arg4: memref<128x128xf32, #tpu.memory_space<vmem>>, %arg5: memref<16x128xf32, #tpu.memory_space<vmem>>, %arg6: memref<16x128xf32, #tpu.memory_space<vmem>>) attributes {dimension_semantics = [#tpu.dimension_semantics<parallel>, #tpu.dimension_semantics<arbitrary>], iteration_bounds = array<i64: 1, 1>, scalar_prefetch = 0 : i64, scratch_operands = 1 : i64, tpu.core_type = #tpu.core_type<tc>, window_params = [{transform_indices = @transform_0, window_bounds = array<i64: 16, 16, 128>}, {pipeline_mode = #tpu.pipeline_mode<synchronous>, transform_indices = @transform_1, window_bounds = array<i64: 128, 128>}, {pipeline_mode = #tpu.pipeline_mode<synchronous>, transform_indices = @transform_2, window_bounds = array<i64: 128, 128>}, {transform_indices = @transform_3, window_bounds = array<i64: 16, 128>}]} {
    %c0_i32 = arith.constant 0 : i32
    %0 = arith.cmpi eq, %arg1, %c0_i32 : i32
    %1 = arith.extui %0 : i1 to i32
    %c0_i32_0 = arith.constant 0 : i32
    %2 = arith.cmpi ne, %1, %c0_i32_0 : i32
    scf.if %2 {
      %cst_9 = arith.constant 0.000000e+00 : f32
      %11 = vector.broadcast %cst_9 : f32 to vector<16x128xf32>
      %c0_10 = arith.constant 0 : index
      %c0_11 = arith.constant 0 : index
      %12 = vector.load %arg6[%c0_10, %c0_11] : memref<16x128xf32, #tpu.memory_space<vmem>>, vector<16x128xf32>
      tpu.vector_store %arg6[%c0_10, %c0_11], %11 {strides = array<i32>} : memref<16x128xf32, #tpu.memory_space<vmem>>, vector<16x128xf32>,
    } else {
    }
    %c0 = arith.constant 0 : index
    %c0_1 = arith.constant 0 : index
    %3 = vector.load %arg6[%c0, %c0_1] : memref<16x128xf32, #tpu.memory_space<vmem>>, vector<16x128xf32>
    %c0_2 = arith.constant 0 : index
    %c0_3 = arith.constant 0 : index
    %c0_4 = arith.constant 0 : index
    %4 = vector.load %arg2[%c0_2, %c0_3, %c0_4] : memref<16x16x128xf32, #tpu.memory_space<vmem>>, vector<16x16x128xf32>
    %cst = arith.constant dense<0.000000e+00> : vector<16x128xf32>
    %5 = vector.multi_reduction <add>, %4, %cst [1] : vector<16x16x128xf32> to vector<16x128xf32>
    %6 = arith.addf %3, %5 : vector<16x128xf32>
    %c0_5 = arith.constant 0 : index
    %c0_6 = arith.constant 0 : index
    %7 = vector.load %arg6[%c0_5, %c0_6] : memref<16x128xf32, #tpu.memory_space<vmem>>, vector<16x128xf32>
    tpu.vector_store %arg6[%c0_5, %c0_6], %6 {strides = array<i32>} : memref<16x128xf32, #tpu.memory_space<vmem>>, vector<16x128xf32>,
    %c0_i32_7 = arith.constant 0 : i32
    %8 = arith.cmpi eq, %arg1, %c0_i32_7 : i32
    %9 = arith.extui %8 : i1 to i32
    %c0_i32_8 = arith.constant 0 : i32
    %10 = arith.cmpi ne, %9, %c0_i32_8 : i32
    scf.if %10 {
      %c0_9 = arith.constant 0 : index
      %c0_10 = arith.constant 0 : index
      %11 = vector.load %arg6[%c0_9, %c0_10] : memref<16x128xf32, #tpu.memory_space<vmem>>, vector<16x128xf32>
      %cst_11 = arith.constant 1.562500e-02 : f32
      %12 = vector.broadcast %cst_11 : f32 to vector<16x128xf32>
      %13 = arith.mulf %11, %12 : vector<16x128xf32>
      %c0_12 = arith.constant 0 : index
      %c0_13 = arith.constant 0 : index
      %14 = vector.load %arg3[%c0_12, %c0_13] : memref<128x128xf32, #tpu.memory_space<vmem>>, vector<128x128xf32>
      %cst_14 = arith.constant dense<0.000000e+00> : vector<16x128xf32>
      %15 = tpu.matmul %13, %14, %cst_14 {dimension_numbers = #tpu.dot_dimension_numbers<[1], [0], [0], [1], [0, 0, 1, 1], [], []>} : vector<16x128xf32>, vector<128x128xf32>, vector<16x128xf32> -> vector<16x128xf32>
      %cst_15 = arith.constant 0.000000e+00 : f32
      %16 = vector.broadcast %cst_15 : f32 to vector<16x128xf32>
      %17 = arith.maximumf %15, %16 : vector<16x128xf32>
      %c0_16 = arith.constant 0 : index
      %c0_17 = arith.constant 0 : index
      %18 = vector.load %arg4[%c0_16, %c0_17] : memref<128x128xf32, #tpu.memory_space<vmem>>, vector<128x128xf32>
      %cst_18 = arith.constant dense<0.000000e+00> : vector<16x128xf32>
      %19 = tpu.matmul %17, %18, %cst_18 {dimension_numbers = #tpu.dot_dimension_numbers<[1], [0], [0], [1], [0, 0, 1, 1], [], []>} : vector<16x128xf32>, vector<128x128xf32>, vector<16x128xf32> -> vector<16x128xf32>
      %c0_19 = arith.constant 0 : index
      %c0_20 = arith.constant 0 : index
      %20 = vector.load %arg5[%c0_19, %c0_20] : memref<16x128xf32, #tpu.memory_space<vmem>>, vector<16x128xf32>
      tpu.vector_store %arg5[%c0_19, %c0_20], %19 {strides = array<i32>} : memref<16x128xf32, #tpu.memory_space<vmem>>, vector<16x128xf32>,
    } else {
    }
    return
  }
  func.func @transform_0(%arg0: i32, %arg1: i32) -> (i32, i32, i32) {
    %c0_i32 = arith.constant 0 : i32
    %c0_i32_0 = arith.constant 0 : i32
    return %arg0, %arg1, %c0_i32 : i32, i32, i32
  }
  func.func @transform_1(%arg0: i32, %arg1: i32) -> (i32, i32) {
    %c0_i32 = arith.constant 0 : i32
    %c0_i32_0 = arith.constant 0 : i32
    %c0_i32_1 = arith.constant 0 : i32
    return %c0_i32, %c0_i32_0 : i32, i32
  }
  func.func @transform_2(%arg0: i32, %arg1: i32) -> (i32, i32) {
    %c0_i32 = arith.constant 0 : i32
    %c0_i32_0 = arith.constant 0 : i32
    %c0_i32_1 = arith.constant 0 : i32
    return %c0_i32, %c0_i32_0 : i32, i32
  }
  func.func @transform_3(%arg0: i32, %arg1: i32) -> (i32, i32) {
    %c0_i32 = arith.constant 0 : i32
    %c0_i32_0 = arith.constant 0 : i32
    return %arg0, %c0_i32 : i32, i32
  }
}

</mosaic_0001>

<bundles_post_ra>
// kernel: tpu_custom_call.1
= control target key start
LH: loop header
LB: loop body
LE: loop exit
PB: predicated region body
PF: predicated region fallthrough
CT: control target
= control target key end

     0   :  { %8 = vsyncpa [#allocation4], 0  ;;  %s570_s0 = inlined_call_operand.hbm [shape: f32[16,16,128], index: 0, kind: input, shape index: {}]   ;;  %s571_s1 = inlined_call_operand.hbm [shape: f32[128,128], index: 1, kind: input, shape index: {}]   ;;  %s572_s2 = inlined_call_operand.hbm [shape: f32[128,128], index: 2, kind: input, shape index: {}]   ;;  %s573_s3 = inlined_call_operand.hbm [shape: f32[16,128], index: 3, kind: output, shape index: {}]  }
   0x1   :  { %9 = vsyncpa [#allocation7], 0 }
   0x2   :  { %10 = vsyncpa [#allocation5], 0  ;;  %s28_s14 = sshll.u32 %s571_s1, 4  ;;  %s506_s15 = smov [#allocation6]   ;;  %s29_s14 = int_to_ptr.hbm [resolvable:$true] %s28_s14 }
   0x3   :  { %s30_s16 = sshll.u32 %s506_s15, 4  ;;  %s15_s19 = sshll.u32 %s570_s0, 4  ;;  %s31_s16 = int_to_ptr.vmem [resolvable:$true] %s30_s16  ;;  %s16_s19 = int_to_ptr.hbm [resolvable:$true] %s15_s19 }
   0x4   :  { %s507_s20 = smov 128   ;;  %s508_s21 = smov 8  }
   0x5   :  { %36 = dma.hbm_to_vmem [thread:$0]  %s29_s14, 2048, %s31_s16, [#allocation7], %s507_s20, %s507_s20, %s508_s21  }
   0x6   :  { %s509_s22 = smov [#allocation3]   ;;  %s41_s1 = sshll.u32 %s572_s2, 4  ;;  %s42_s1 = int_to_ptr.hbm [resolvable:$true] %s41_s1 }
   0x7   :  { %s17_s23 = sshll.u32 %s509_s22, 4  ;;  %s510_s0 = smov [#allocation8]   ;;  %s18_s23 = int_to_ptr.vmem [resolvable:$true] %s17_s23 }
   0x8   :  { %23 = dma.hbm_to_vmem [thread:$0]  %s16_s19, 4096, %s18_s23, [#allocation4], %s507_s20, %s507_s20, %s508_s21  }
   0x9   :  { %s43_s26 = sshll.u32 %s510_s0, 4  ;;  %s44_s26 = int_to_ptr.vmem [resolvable:$true] %s43_s26 }
   0xa   :  { %49 = dma.hbm_to_vmem [thread:$0]  %s42_s1, 2048, %s44_s26, [#allocation7], %s507_s20, %s507_s20, %s508_s21  }
   0xb   :  { %500 = dma.done.wait [#allocation4], 4096  }
   0xc   :  { %501 = vsyncadd [#allocation4], 4294963200 }
   0xd   :  { %502 = dma.done.wait [#allocation7], 4096  }
   0xe   :  { %503 = vsyncadd [#allocation7], 4294963200  ;;  %v279_v0 = vld [vmem:[#allocation6 + $0x78] sm:$0xff]  ;;  %v278_v1 = vld [vmem:[#allocation6 + $0x70] sm:$0xff]  ;;  %vm230_vm0 = vcmask 1041409   ;;  %vm232_vm1 = vcmask 1042434  }
   0xf   :  { %366 = vmatpush.msra.mxu2 %v279_v0  ;;  %280 = vmatpush.msra.mxu0 %v279_v0  ;;  %v277_v2 = vld [vmem:[#allocation6 + $0x68] sm:$0xff]  ;;  %v276_v3 = vld [vmem:[#allocation6 + $0x60] sm:$0xff]  ;;  %v275_v4 = vld [vmem:[#allocation6 + $0x58] sm:$0xff]  ;;  %vm234_vm2 = vcmask 1043459   ;;  %vm236_vm3 = vcmask 1044484   ;;  %vm238_vm4 = vcmask 1045509  }
  0x10   :  { %v86_v5 = vld [vmem:[#allocation3 + $0x80] sm:$0xff]  ;;  %v87_v6 = vld [vmem:[#allocation3 + $0x88] sm:$0xff]  ;;  %v274_v7 = vld [vmem:[#allocation6 + $0x50] sm:$0xff]  ;;  %vm240_vm5 = vcmask 1046534   ;;  %vm242_vm6 = vcmask 1047559   ;;  %s511_s2 = smov [#allocation9]  }
  0x11   :  { %367 = vmatpush.msra.mxu2 %v278_v1  ;;  %281 = vmatpush.msra.mxu0 %v278_v1  ;;  %v88_v8 = vld [vmem:[#allocation3 + $0x90] sm:$0xff]  ;;  %v89_v9 = vld [vmem:[#allocation3 + $0x98] sm:$0xff]  ;;  %v90_v10 = vld [vmem:[#allocation3 + $0xa0] sm:$0xff]  ;;  %v158_v11 = vadd.f32 %v87_v6, %v86_v5  ;;  %s350_s27 = sshll.u32 %s511_s2, 4  ;;  %s352_s30 = sshll.u32 %s573_s3, 4  ;;  %s351_s27 = int_to_ptr.vmem [resolvable:$true] %s350_s27  ;;  %s353_s30 = int_to_ptr.hbm [resolvable:$true] %s352_s30 }
  0x12   :  { %v91_v12 = vld [vmem:[#allocation3 + $0xa8] sm:$0xff]  ;;  %v92_v13 = vld [vmem:[#allocation3 + $0xb0] sm:$0xff]  ;;  %v93_v14 = vld [vmem:[#allocation3 + $0xb8] sm:$0xff]  ;;  %v165_v15 = vadd.f32 %v89_v9, %v88_v8 }
  0x13   :  { %368 = vmatpush.msra.mxu2 %v277_v2  ;;  %282 = vmatpush.msra.mxu0 %v277_v2  ;;  %v94_v16 = vld [vmem:[#allocation3 + $0xc0] sm:$0xff]  ;;  %v95_v17 = vld [vmem:[#allocation3 + $0xc8] sm:$0xff]  ;;  %v96_v18 = vld [vmem:[#allocation3 + $0xd0] sm:$0xff]  ;;  %v159_v19 = vrot.slane %v158_v11, 4  ;;  %v172_v20 = vadd.f32 %v91_v12, %v90_v10  ;;  %v179_v21 = vadd.f32 %v93_v14, %v92_v13 }
  0x14   :  { %v97_v22 = vld [vmem:[#allocation3 + $0xd8] sm:$0xff]  ;;  %v98_v23 = vld [vmem:[#allocation3 + $0xe0] sm:$0xff]  ;;  %v99_v24 = vld [vmem:[#allocation3 + $0xe8] sm:$0xff]  ;;  %v166_v25 = vrot.slane %v165_v15, 4  ;;  %v186_v26 = vadd.f32 %v95_v17, %v94_v16 }
  0x15   :  { %369 = vmatpush.msra.mxu2 %v276_v3  ;;  %283 = vmatpush.msra.mxu0 %v276_v3  ;;  %v273_v27 = vld [vmem:[#allocation6 + $0x48] sm:$0xff]  ;;  %v100_v28 = vld [vmem:[#allocation3 + $0xf0] sm:$0xff]  ;;  %v101_v29 = vld [vmem:[#allocation3 + $0xf8] sm:$0xff]  ;;  %v160_v30 = vadd.f32 %v159_v19, %v158_v11  ;;  %v173_v31 = vrot.slane %v172_v20, 4  ;;  %v180_v32 = vrot.slane %v179_v21, 4  ;;  %v193_v33 = vadd.f32 %v97_v22, %v96_v18 }
  0x16   :  { %v167_v34 = vadd.f32 %v166_v25, %v165_v15  ;;  %v187_v35 = vrot.slane %v186_v26, 4  ;;  %v200_v36 = vadd.f32 %v99_v24, %v98_v23  ;;  %v207_v37 = vadd.f32 %v101_v29, %v100_v28  ;;  %v272_v38 = vld [vmem:[#allocation6 + $0x40] sm:$0xff]  ;;  %v271_v47 = vld [vmem:[#allocation6 + $0x38] sm:$0xff]  ;;  %v270_v56 = vld [vmem:[#allocation6 + $0x30] sm:$0xff] }
  0x17   :  { %370 = vmatpush.msra.mxu2 %v275_v4  ;;  %284 = vmatpush.msra.mxu0 %v275_v4  ;;  %v161_v39 = vrot.slane %v160_v30, 2  ;;  %v174_v40 = vadd.f32 %v173_v31, %v172_v20  ;;  %v181_v41 = vadd.f32 %v180_v32, %v179_v21  ;;  %v194_v42 = vrot.slane %v193_v33, 4  ;;  %v320_v61 = vld [vmem:[#allocation8 + $0x78] sm:$0xff]  ;;  %v70_v2 = vld [vmem:[#allocation3] sm:$0xff]  ;;  %v71_v3 = vld [vmem:[#allocation3 + $0x8] sm:$0xff] }
  0x18   :  { %v168_v43 = vrot.slane %v167_v34, 2  ;;  %v188_v44 = vadd.f32 %v187_v35, %v186_v26  ;;  %v201_v45 = vrot.slane %v200_v36, 4  ;;  %v208_v46 = vrot.slane %v207_v37, 4  ;;  %v319_v4 = vld [vmem:[#allocation8 + $0x70] sm:$0xff]  ;;  %v269_v5 = vld [vmem:[#allocation6 + $0x28] sm:$0xff]  ;;  %382 = vmatpush.msra.mxu3 %v320_v61  ;;  %321 = vmatpush.msra.mxu1 %v320_v61  ;;  %v73_v15 = vld [vmem:[#allocation3 + $0x18] sm:$0xff] }
  0x19   :  { %371 = vmatpush.msra.mxu2 %v274_v7  ;;  %285 = vmatpush.msra.mxu0 %v274_v7  ;;  %v162_v48 = vadd.f32 %v161_v39, %v160_v30  ;;  %v175_v49 = vrot.slane %v174_v40, 2  ;;  %v182_v50 = vrot.slane %v181_v41, 2  ;;  %v195_v51 = vadd.f32 %v194_v42, %v193_v33  ;;  %v72_v14 = vld [vmem:[#allocation3 + $0x10] sm:$0xff]  ;;  %v318_v16 = vld [vmem:[#allocation8 + $0x68] sm:$0xff]  ;;  %v268_v17 = vld [vmem:[#allocation6 + $0x20] sm:$0xff] }
  0x1a   :  { %v169_v52 = vadd.f32 %v168_v43, %v167_v34  ;;  %v189_v53 = vrot.slane %v188_v44, 2  ;;  %v202_v54 = vadd.f32 %v201_v45, %v200_v36  ;;  %v209_v55 = vadd.f32 %v208_v46, %v207_v37  ;;  %v267_v18 = vld [vmem:[#allocation6 + $0x18] sm:$0xff]  ;;  %v74_v22 = vld [vmem:[#allocation3 + $0x20] sm:$0xff]  ;;  %383 = vmatpush.msra.mxu3 %v319_v4  ;;  %322 = vmatpush.msra.mxu1 %v319_v4  ;;  %v75_v28 = vld [vmem:[#allocation3 + $0x28] sm:$0xff] }
  0x1b   :  { %372 = vmatpush.msra.mxu2 %v273_v27  ;;  %286 = vmatpush.msra.mxu0 %v273_v27  ;;  %v163_v57 = vrot.slane %v162_v48, 1  ;;  %v176_v58 = vadd.f32 %v175_v49, %v174_v40  ;;  %v183_v59 = vadd.f32 %v182_v50, %v181_v41  ;;  %v196_v60 = vrot.slane %v195_v51, 2  ;;  %v76_v29 = vld [vmem:[#allocation3 + $0x30] sm:$0xff]  ;;  %v317_v30 = vld [vmem:[#allocation8 + $0x60] sm:$0xff]  ;;  %v77_v33 = vld [vmem:[#allocation3 + $0x38] sm:$0xff] }
  0x1c   :  { %v170_v62 = vrot.slane %v169_v52, 1  ;;  %v190_v63 = vadd.f32 %v189_v53, %v188_v44  ;;  %v203_v0 = vrot.slane %v202_v54, 2  ;;  %v210_v1 = vrot.slane %v209_v55, 2  ;;  %v78_v34 = vld [vmem:[#allocation3 + $0x40] sm:$0xff]  ;;  %v79_v35 = vld [vmem:[#allocation3 + $0x48] sm:$0xff]  ;;  %384 = vmatpush.msra.mxu3 %v318_v16  ;;  %323 = vmatpush.msra.mxu1 %v318_v16  ;;  %v316_v41 = vld [vmem:[#allocation8 + $0x58] sm:$0xff] }
  0x1d   :  { %373 = vmatpush.msra.mxu2 %v272_v38  ;;  %287 = vmatpush.msra.mxu0 %v272_v38  ;;  %v164_v6 = vadd.f32 %v163_v57, %v162_v48  ;;  %v177_v7 = vrot.slane %v176_v58, 1  ;;  %v184_v8 = vrot.slane %v183_v59, 1  ;;  %v197_v9 = vadd.f32 %v196_v60, %v195_v51  ;;  %v266_v42 = vld [vmem:[#allocation6 + $0x10] sm:$0xff]  ;;  %v81_v45 = vld [vmem:[#allocation3 + $0x58] sm:$0xff]  ;;  %v265_v53 = vld [vmem:[#allocation6 + $0x8] sm:$0xff] }
  0x1e   :  { %v171_v10 = vadd.f32 %v170_v62, %v169_v52  ;;  %v191_v11 = vrot.slane %v190_v63, 1  ;;  %v204_v12 = vadd.f32 %v203_v0, %v202_v54  ;;  %v211_v13 = vadd.f32 %v210_v1, %v209_v55  ;;  %v80_v44 = vld [vmem:[#allocation3 + $0x50] sm:$0xff]  ;;  %385 = vmatpush.msra.mxu3 %v317_v30  ;;  %324 = vmatpush.msra.mxu1 %v317_v30  ;;  %v82_v55 = vld [vmem:[#allocation3 + $0x60] sm:$0xff]  ;;  %v85_v62 = vld [vmem:[#allocation3 + $0x78] sm:$0xff] }
  0x1f   :  { %374 = vmatpush.msra.mxu2 %v271_v47  ;;  %288 = vmatpush.msra.mxu0 %v271_v47  ;;  %v178_v19 = vadd.f32 %v177_v7, %v176_v58  ;;  %v185_v20 = vadd.f32 %v184_v8, %v183_v59  ;;  %v198_v21 = vrot.slane %v197_v9, 1  ;;  %v102_v23 = vadd.f32 %v71_v3, %v70_v2  ;;  %v315_v52 = vld [vmem:[#allocation8 + $0x50] sm:$0xff]  ;;  %v314_v2 = vld [vmem:[#allocation8 + $0x48] sm:$0xff]  ;;  %v264_v3 = vld [vmem:[#allocation6] sm:$0xff] }
  0x20   :  { %v192_v24 = vadd.f32 %v191_v11, %v190_v63  ;;  %v205_v25 = vrot.slane %v204_v12, 1  ;;  %v212_v26 = vrot.slane %v211_v13, 1  ;;  %v244_v27 = vsel %vm230_vm0, %v171_v10, %v164_v6  ;;  %386 = vmatpush.msra.mxu3 %v316_v41  ;;  %325 = vmatpush.msra.mxu1 %v316_v41  ;;  %v84_v61 = vld [vmem:[#allocation3 + $0x70] sm:$0xff] }
  0x21   :  { %375 = vmatpush.msra.mxu2 %v270_v56  ;;  %289 = vmatpush.msra.mxu0 %v270_v56  ;;  %v199_v31 = vadd.f32 %v198_v21, %v197_v9  ;;  %v245_v32 = vsel %vm232_vm1, %v178_v19, %v244_v27  ;;  %v103_v36 = vrot.slane %v102_v23, 4  ;;  %v109_v37 = vadd.f32 %v73_v15, %v72_v14  ;;  %v83_v56 = vld [vmem:[#allocation3 + $0x68] sm:$0xff]  ;;  %v312_v21 = vld [vmem:[#allocation8 + $0x38] sm:$0xff]  ;;  %v311_v30 = vld [vmem:[#allocation8 + $0x30] sm:$0xff] }
  0x22   :  { %v206_v38 = vadd.f32 %v205_v25, %v204_v12  ;;  %v213_v39 = vadd.f32 %v212_v26, %v211_v13  ;;  %v246_v40 = vsel %vm234_vm2, %v185_v20, %v245_v32  ;;  %v116_v48 = vadd.f32 %v75_v28, %v74_v22  ;;  %387 = vmatpush.msra.mxu3 %v315_v52  ;;  %v313_v12 = vld [vmem:[#allocation8 + $0x40] sm:$0xff] }
  0x23   :  { %376 = vmatpush.msra.mxu2 %v269_v5  ;;  %290 = vmatpush.msra.mxu0 %v269_v5  ;;  %v247_v43 = vsel %vm236_vm3, %v192_v24, %v246_v40  ;;  %v104_v46 = vadd.f32 %v103_v36, %v102_v23  ;;  %v110_v47 = vrot.slane %v109_v37, 4  ;;  %v123_v50 = vadd.f32 %v77_v33, %v76_v29 }
  0x24   :  { %v248_v49 = vsel %vm238_vm4, %v199_v31, %v247_v43  ;;  %v130_v51 = vadd.f32 %v79_v35, %v78_v34  ;;  %v117_v59 = vrot.slane %v116_v48, 4  ;;  %v137_v1 = vadd.f32 %v81_v45, %v80_v44  ;;  %326 = vmatpush.msra.mxu1 %v315_v52  ;;  %388 = vmatpush.msra.mxu3 %v314_v2  ;;  %v308_v52 = vld [vmem:[#allocation8 + $0x18] sm:$0xff] }
  0x25   :  { %377 = vmatpush.msra.mxu2 %v268_v17  ;;  %291 = vmatpush.msra.mxu0 %v268_v17  ;;  %v249_v54 = vsel %vm240_vm5, %v206_v38, %v248_v49  ;;  %v105_v57 = vrot.slane %v104_v46, 2  ;;  %v111_v58 = vadd.f32 %v110_v47, %v109_v37  ;;  %v124_v63 = vrot.slane %v123_v50, 4  ;;  %v310_v38 = vld [vmem:[#allocation8 + $0x28] sm:$0xff] }
  0x26   :  { %v250_v60 = vsel %vm242_vm6, %v213_v39, %v249_v54  ;;  %v131_v0 = vrot.slane %v130_v51, 4  ;;  %v118_v7 = vadd.f32 %v117_v59, %v116_v48  ;;  %v138_v10 = vrot.slane %v137_v1, 4  ;;  %327 = vmatpush.msra.mxu1 %v314_v2  ;;  %389 = vmatpush.msra.mxu3 %v313_v12 }
  0x27   :  { %378 = vmatpush.msra.mxu2 %v267_v18  ;;  %292 = vmatpush.msra.mxu0 %v267_v18  ;;  %v263_v4 = vmul.f32 0.015625, %v250_v60  ;;  %v106_v5 = vadd.f32 %v105_v57, %v104_v46  ;;  %v112_v6 = vrot.slane %v111_v58, 2  ;;  %v125_v8 = vadd.f32 %v124_v63, %v123_v50  ;;  %v309_v46 = vld [vmem:[#allocation8 + $0x20] sm:$0xff]  ;;  %v307_v57 = vld [vmem:[#allocation8 + $0x10] sm:$0xff] }
  0x28   :  { %v132_v9 = vadd.f32 %v131_v0, %v130_v51  ;;  %v144_v11 = vadd.f32 %v83_v56, %v82_v55  ;;  %v119_v15 = vrot.slane %v118_v7, 2  ;;  %v151_v16 = vadd.f32 %v85_v62, %v84_v61  ;;  %328 = vmatpush.msra.mxu1 %v313_v12  ;;  %390 = vmatpush.msra.mxu3 %v312_v21  ;;  %v306_v62 = vld [vmem:[#allocation8 + $0x8] sm:$0xff]  ;;  %v305_v63 = vld [vmem:[#allocation8] sm:$0xff] }
  0x29   :  { %379 = vmatpush.msra.mxu2 %v266_v42  ;;  %293 = vmatpush.msra.mxu0 %v266_v42  ;;  %v107_v13 = vrot.slane %v106_v5, 1  ;;  %v113_v14 = vadd.f32 %v112_v6, %v111_v58  ;;  %v126_v17 = vrot.slane %v125_v8, 2  ;;  %v139_v19 = vadd.f32 %v138_v10, %v137_v1 }
  0x2a   :  { %v133_v18 = vrot.slane %v132_v9, 2  ;;  %v145_v20 = vrot.slane %v144_v11, 4  ;;  %v120_v24 = vadd.f32 %v119_v15, %v118_v7  ;;  %v152_v25 = vrot.slane %v151_v16, 4  ;;  %329 = vmatpush.msra.mxu1 %v312_v21  ;;  %391 = vmatpush.msra.mxu3 %v311_v30 }
  0x2b   :  { %380 = vmatpush.msra.mxu2 %v265_v53  ;;  %294 = vmatpush.msra.mxu0 %v265_v53  ;;  %v108_v22 = vadd.f32 %v107_v13, %v106_v5  ;;  %v114_v23 = vrot.slane %v113_v14, 1  ;;  %v127_v26 = vadd.f32 %v126_v17, %v125_v8  ;;  %v140_v28 = vrot.slane %v139_v19, 2 }
  0x2c   :  { %v134_v27 = vadd.f32 %v133_v18, %v132_v9  ;;  %v146_v29 = vadd.f32 %v145_v20, %v144_v11  ;;  %v121_v32 = vrot.slane %v120_v24, 1  ;;  %v153_v33 = vadd.f32 %v152_v25, %v151_v16  ;;  %330 = vmatpush.msra.mxu1 %v311_v30  ;;  %392 = vmatpush.msra.mxu3 %v310_v38 }
  0x2d   :  { %381 = vmatpush.msra.mxu2 %v264_v3  ;;  %295 = vmatpush.msra.mxu0 %v264_v3  ;;  %v115_v31 = vadd.f32 %v114_v23, %v113_v14  ;;  %v128_v34 = vrot.slane %v127_v26, 1  ;;  %v141_v36 = vadd.f32 %v140_v28, %v139_v19 }
  0x2e   :  { %299 = vmatmul.f32.vlgmr.msra.gmra.mxu2 %v263_v4  ;;  %v135_v35 = vrot.slane %v134_v27, 1  ;;  %v147_v37 = vrot.slane %v146_v29, 2  ;;  %v122_v39 = vadd.f32 %v121_v32, %v120_v24  ;;  %v154_v40 = vrot.slane %v153_v33, 2  ;;  %331 = vmatpush.msra.mxu1 %v310_v38 }
  0x2f   :  { %v231_v41 = vsel %vm230_vm0, %v115_v31, %v108_v22  ;;  %v129_v42 = vadd.f32 %v128_v34, %v127_v26  ;;  %v142_v44 = vrot.slane %v141_v36, 1  ;;  %393 = vmatpush.msra.mxu3 %v309_v46 }
  0x30   :  { %v136_v43 = vadd.f32 %v135_v35, %v134_v27  ;;  %v148_v45 = vadd.f32 %v147_v37, %v146_v29  ;;  %v155_v47 = vadd.f32 %v154_v40, %v153_v33  ;;  %v233_v48 = vsel %vm232_vm1, %v122_v39, %v231_v41  ;;  %332 = vmatpush.msra.mxu1 %v309_v46 }
  0x31   :  { %v143_v49 = vadd.f32 %v142_v44, %v141_v36  ;;  %v235_v51 = vsel %vm234_vm2, %v129_v42, %v233_v48  ;;  %394 = vmatpush.msra.mxu3 %v308_v52 }
  0x32   :  { %v149_v50 = vrot.slane %v148_v45, 1  ;;  %v156_v53 = vrot.slane %v155_v47, 1  ;;  %v237_v54 = vsel %vm236_vm3, %v136_v43, %v235_v51  ;;  %333 = vmatpush.msra.mxu1 %v308_v52 }
  0x33   :  { %v239_v56 = vsel %vm238_vm4, %v143_v49, %v237_v54  ;;  %395 = vmatpush.msra.mxu3 %v307_v57 }
  0x34   :  { %v150_v55 = vadd.f32 %v149_v50, %v148_v45  ;;  %v157_v58 = vadd.f32 %v156_v53, %v155_v47  ;;  %334 = vmatpush.msra.mxu1 %v307_v57 }
  0x35   :  { %396 = vmatpush.msra.mxu3 %v306_v62 }
  0x36   :  { %v241_v59 = vsel %vm240_vm5, %v150_v55, %v239_v56  ;;  %335 = vmatpush.msra.mxu1 %v306_v62 }
  0x37   :  { %v243_v60 = vsel %vm242_vm6, %v157_v58, %v241_v59  ;;  %397 = vmatpush.msra.mxu3 %v305_v63 }
  0x38   :  { %v262_v61 = vmul.f32 0.015625, %v243_v60  ;;  %336 = vmatpush.msra.mxu1 %v305_v63 }
  0x3a   :  { %296 = vmatmul.f32.vlgmr.msra.gmra.mxu0 %v262_v61 }
  0xb1   :  { %v300_v0 = vpop.f32.mrf.mxu2 }
  0xb2   :  { %v304_v1 = vmax.f32 %v300_v0, 0.0 }
  0xb4   :  { %340 = vmatmul.f32.vlgmr.msra.gmra.mxu3 %v304_v1 }
  0xb7   :  { %v297_v2 = vpop.f32.mrf.mxu0 }
  0xb8   :  { %v303_v3 = vmax.f32 %v297_v2, 0.0 }
  0xba   :  { %337 = vmatmul.f32.vlgmr.msra.gmra.mxu1 %v303_v3 }
 0x137   :  { %v341_v4 = vpop.f32.mrf.mxu3  ;;  %v338_v5 = vpop.f32.mrf.mxu1 }
 0x138   :  { %345 = vst [vmem:[#allocation9 + $0x8] sm:$0xff] %v341_v4 }
 0x139   :  { %344 = vst [vmem:[#allocation9] sm:$0xff] %v338_v5 }
 0x13a   :  { %358 = dma.vmem_to_hbm [thread:$0]  %s351_s27, 256, %s353_s30, [#allocation5], %s507_s20, %s507_s20, %s508_s21  }
 0x13b   :  { %504 = dma.done.wait [#allocation5], 256  }
 0x13c   :  { %505 = vsyncadd [#allocation5], 4294967040 }
 0x13d   :  { %363 = vsyncpa [#allocation4], 1 }
 0x13e   :  { %364 = vsyncpa [#allocation7], 1 }
 0x13f   :  { %365 = vsyncpa [#allocation5], 1 }

// kernel: tpu_custom_call.1
= control target key start
LH: loop header
LB: loop body
LE: loop exit
PB: predicated region body
PF: predicated region fallthrough
CT: control target
= control target key end

     0   :  { %8 = vsyncpa [#allocation4], 0  ;;  %s570_s0 = inlined_call_operand.hbm [shape: f32[16,16,128], index: 0, kind: input, shape index: {}]   ;;  %s571_s1 = inlined_call_operand.hbm [shape: f32[128,128], index: 1, kind: input, shape index: {}]   ;;  %s572_s2 = inlined_call_operand.hbm [shape: f32[128,128], index: 2, kind: input, shape index: {}]   ;;  %s573_s3 = inlined_call_operand.hbm [shape: f32[16,128], index: 3, kind: output, shape index: {}]  }
   0x1   :  { %9 = vsyncpa [#allocation7], 0 }
   0x2   :  { %10 = vsyncpa [#allocation5], 0  ;;  %s28_s14 = sshll.u32 %s571_s1, 4  ;;  %s506_s15 = smov [#allocation6]   ;;  %s29_s14 = int_to_ptr.hbm [resolvable:$true] %s28_s14 }
   0x3   :  { %s30_s16 = sshll.u32 %s506_s15, 4  ;;  %s15_s19 = sshll.u32 %s570_s0, 4  ;;  %s31_s16 = int_to_ptr.vmem [resolvable:$true] %s30_s16  ;;  %s16_s19 = int_to_ptr.hbm [resolvable:$true] %s15_s19 }
   0x4   :  { %s507_s20 = smov 128   ;;  %s508_s21 = smov 8  }
   0x5   :  { %36 = dma.hbm_to_vmem [thread:$0]  %s29_s14, 2048, %s31_s16, [#allocation7], %s507_s20, %s507_s20, %s508_s21  }
   0x6   :  { %s509_s22 = smov [#allocation3]   ;;  %s41_s1 = sshll.u32 %s572_s2, 4  ;;  %s42_s1 = int_to_ptr.hbm [resolvable:$true] %s41_s1 }
   0x7   :  { %s17_s23 = sshll.u32 %s509_s22, 4  ;;  %s510_s0 = smov [#allocation8]   ;;  %s18_s23 = int_to_ptr.vmem [resolvable:$true] %s17_s23 }
   0x8   :  { %23 = dma.hbm_to_vmem [thread:$0]  %s16_s19, 4096, %s18_s23, [#allocation4], %s507_s20, %s507_s20, %s508_s21  }
   0x9   :  { %s43_s26 = sshll.u32 %s510_s0, 4  ;;  %s44_s26 = int_to_ptr.vmem [resolvable:$true] %s43_s26 }
   0xa   :  { %49 = dma.hbm_to_vmem [thread:$0]  %s42_s1, 2048, %s44_s26, [#allocation7], %s507_s20, %s507_s20, %s508_s21  }
   0xb   :  { %500 = dma.done.wait [#allocation4], 4096  }
   0xc   :  { %501 = vsyncadd [#allocation4], 4294963200 }
   0xd   :  { %502 = dma.done.wait [#allocation7], 4096  }
   0xe   :  { %503 = vsyncadd [#allocation7], 4294963200  ;;  %v279_v0 = vld [vmem:[#allocation6 + $0x78] sm:$0xff]  ;;  %v278_v1 = vld [vmem:[#allocation6 + $0x70] sm:$0xff]  ;;  %vm230_vm0 = vcmask 1041409   ;;  %vm232_vm1 = vcmask 1042434  }
   0xf   :  { %366 = vmatpush.msra.mxu2 %v279_v0  ;;  %280 = vmatpush.msra.mxu0 %v279_v0  ;;  %v277_v2 = vld [vmem:[#allocation6 + $0x68] sm:$0xff]  ;;  %v276_v3 = vld [vmem:[#allocation6 + $0x60] sm:$0xff]  ;;  %v275_v4 = vld [vmem:[#allocation6 + $0x58] sm:$0xff]  ;;  %vm234_vm2 = vcmask 1043459   ;;  %vm236_vm3 = vcmask 1044484   ;;  %vm238_vm4 = vcmask 1045509  }
  0x10   :  { %v86_v5 = vld [vmem:[#allocation3 + $0x80] sm:$0xff]  ;;  %v87_v6 = vld [vmem:[#allocation3 + $0x88] sm:$0xff]  ;;  %v274_v7 = vld [vmem:[#allocation6 + $0x50] sm:$0xff]  ;;  %vm240_vm5 = vcmask 1046534   ;;  %vm242_vm6 = vcmask 1047559   ;;  %s511_s2 = smov [#allocation9]  }
  0x11   :  { %367 = vmatpush.msra.mxu2 %v278_v1  ;;  %281 = vmatpush.msra.mxu0 %v278_v1  ;;  %v88_v8 = vld [vmem:[#allocation3 + $0x90] sm:$0xff]  ;;  %v89_v9 = vld [vmem:[#allocation3 + $0x98] sm:$0xff]  ;;  %v90_v10 = vld [vmem:[#allocation3 + $0xa0] sm:$0xff]  ;;  %v158_v11 = vadd.f32 %v87_v6, %v86_v5  ;;  %s350_s27 = sshll.u32 %s511_s2, 4  ;;  %s352_s30 = sshll.u32 %s573_s3, 4  ;;  %s351_s27 = int_to_ptr.vmem [resolvable:$true] %s350_s27  ;;  %s353_s30 = int_to_ptr.hbm [resolvable:$true] %s352_s30 }
  0x12   :  { %v91_v12 = vld [vmem:[#allocation3 + $0xa8] sm:$0xff]  ;;  %v92_v13 = vld [vmem:[#allocation3 + $0xb0] sm:$0xff]  ;;  %v93_v14 = vld [vmem:[#allocation3 + $0xb8] sm:$0xff]  ;;  %v165_v15 = vadd.f32 %v89_v9, %v88_v8 }
  0x13   :  { %368 = vmatpush.msra.mxu2 %v277_v2  ;;  %282 = vmatpush.msra.mxu0 %v277_v2  ;;  %v94_v16 = vld [vmem:[#allocation3 + $0xc0] sm:$0xff]  ;;  %v95_v17 = vld [vmem:[#allocation3 + $0xc8] sm:$0xff]  ;;  %v96_v18 = vld [vmem:[#allocation3 + $0xd0] sm:$0xff]  ;;  %v159_v19 = vrot.slane %v158_v11, 4  ;;  %v172_v20 = vadd.f32 %v91_v12, %v90_v10  ;;  %v179_v21 = vadd.f32 %v93_v14, %v92_v13 }
  0x14   :  { %v97_v22 = vld [vmem:[#allocation3 + $0xd8] sm:$0xff]  ;;  %v98_v23 = vld [vmem:[#allocation3 + $0xe0] sm:$0xff]  ;;  %v99_v24 = vld [vmem:[#allocation3 + $0xe8] sm:$0xff]  ;;  %v166_v25 = vrot.slane %v165_v15, 4  ;;  %v186_v26 = vadd.f32 %v95_v17, %v94_v16 }
  0x15   :  { %369 = vmatpush.msra.mxu2 %v276_v3  ;;  %283 = vmatpush.msra.mxu0 %v276_v3  ;;  %v273_v27 = vld [vmem:[#allocation6 + $0x48] sm:$0xff]  ;;  %v100_v28 = vld [vmem:[#allocation3 + $0xf0] sm:$0xff]  ;;  %v101_v29 = vld [vmem:[#allocation3 + $0xf8] sm:$0xff]  ;;  %v160_v30 = vadd.f32 %v159_v19, %v158_v11  ;;  %v173_v31 = vrot.slane %v172_v20, 4  ;;  %v180_v32 = vrot.slane %v179_v21, 4  ;;  %v193_v33 = vadd.f32 %v97_v22, %v96_v18 }
  0x16   :  { %v167_v34 = vadd.f32 %v166_v25, %v165_v15  ;;  %v187_v35 = vrot.slane %v186_v26, 4  ;;  %v200_v36 = vadd.f32 %v99_v24, %v98_v23  ;;  %v207_v37 = vadd.f32 %v101_v29, %v100_v28  ;;  %v272_v38 = vld [vmem:[#allocation6 + $0x40] sm:$0xff]  ;;  %v271_v47 = vld [vmem:[#allocation6 + $0x38] sm:$0xff]  ;;  %v270_v56 = vld [vmem:[#allocation6 + $0x30] sm:$0xff] }
  0x17   :  { %370 = vmatpush.msra.mxu2 %v275_v4  ;;  %284 = vmatpush.msra.mxu0 %v275_v4  ;;  %v161_v39 = vrot.slane %v160_v30, 2  ;;  %v174_v40 = vadd.f32 %v173_v31, %v172_v20  ;;  %v181_v41 = vadd.f32 %v180_v32, %v179_v21  ;;  %v194_v42 = vrot.slane %v193_v33, 4  ;;  %v320_v61 = vld [vmem:[#allocation8 + $0x78] sm:$0xff]  ;;  %v70_v2 = vld [vmem:[#allocation3] sm:$0xff]  ;;  %v71_v3 = vld [vmem:[#allocation3 + $0x8] sm:$0xff] }
  0x18   :  { %v168_v43 = vrot.slane %v167_v34, 2  ;;  %v188_v44 = vadd.f32 %v187_v35, %v186_v26  ;;  %v201_v45 = vrot.slane %v200_v36, 4  ;;  %v208_v46 = vrot.slane %v207_v37, 4  ;;  %v319_v4 = vld [vmem:[#allocation8 + $0x70] sm:$0xff]  ;;  %v269_v5 = vld [vmem:[#allocation6 + $0x28] sm:$0xff]  ;;  %382 = vmatpush.msra.mxu3 %v320_v61  ;;  %321 = vmatpush.msra.mxu1 %v320_v61  ;;  %v73_v15 = vld [vmem:[#allocation3 + $0x18] sm:$0xff] }
  0x19   :  { %371 = vmatpush.msra.mxu2 %v274_v7  ;;  %285 = vmatpush.msra.mxu0 %v274_v7  ;;  %v162_v48 = vadd.f32 %v161_v39, %v160_v30  ;;  %v175_v49 = vrot.slane %v174_v40, 2  ;;  %v182_v50 = vrot.slane %v181_v41, 2  ;;  %v195_v51 = vadd.f32 %v194_v42, %v193_v33  ;;  %v72_v14 = vld [vmem:[#allocation3 + $0x10] sm:$0xff]  ;;  %v318_v16 = vld [vmem:[#allocation8 + $0x68] sm:$0xff]  ;;  %v268_v17 = vld [vmem:[#allocation6 + $0x20] sm:$0xff] }
  0x1a   :  { %v169_v52 = vadd.f32 %v168_v43, %v167_v34  ;;  %v189_v53 = vrot.slane %v188_v44, 2  ;;  %v202_v54 = vadd.f32 %v201_v45, %v200_v36  ;;  %v209_v55 = vadd.f32 %v208_v46, %v207_v37  ;;  %v267_v18 = vld [vmem:[#allocation6 + $0x18] sm:$0xff]  ;;  %v74_v22 = vld [vmem:[#allocation3 + $0x20] sm:$0xff]  ;;  %383 = vmatpush.msra.mxu3 %v319_v4  ;;  %322 = vmatpush.msra.mxu1 %v319_v4  ;;  %v75_v28 = vld [vmem:[#allocation3 + $0x28] sm:$0xff] }
  0x1b   :  { %372 = vmatpush.msra.mxu2 %v273_v27  ;;  %286 = vmatpush.msra.mxu0 %v273_v27  ;;  %v163_v57 = vrot.slane %v162_v48, 1  ;;  %v176_v58 = vadd.f32 %v175_v49, %v174_v40  ;;  %v183_v59 = vadd.f32 %v182_v50, %v181_v41  ;;  %v196_v60 = vrot.slane %v195_v51, 2  ;;  %v76_v29 = vld [vmem:[#allocation3 + $0x30] sm:$0xff]  ;;  %v317_v30 = vld [vmem:[#allocation8 + $0x60] sm:$0xff]  ;;  %v77_v33 = vld [vmem:[#allocation3 + $0x38] sm:$0xff] }
  0x1c   :  { %v170_v62 = vrot.slane %v169_v52, 1  ;;  %v190_v63 = vadd.f32 %v189_v53, %v188_v44  ;;  %v203_v0 = vrot.slane %v202_v54, 2  ;;  %v210_v1 = vrot.slane %v209_v55, 2  ;;  %v78_v34 = vld [vmem:[#allocation3 + $0x40] sm:$0xff]  ;;  %v79_v35 = vld [vmem:[#allocation3 + $0x48] sm:$0xff]  ;;  %384 = vmatpush.msra.mxu3 %v318_v16  ;;  %323 = vmatpush.msra.mxu1 %v318_v16  ;;  %v316_v41 = vld [vmem:[#allocation8 + $0x58] sm:$0xff] }
  0x1d   :  { %373 = vmatpush.msra.mxu2 %v272_v38  ;;  %287 = vmatpush.msra.mxu0 %v272_v38  ;;  %v164_v6 = vadd.f32 %v163_v57, %v162_v48  ;;  %v177_v7 = vrot.slane %v176_v58, 1  ;;  %v184_v8 = vrot.slane %v183_v59, 1  ;;  %v197_v9 = vadd.f32 %v196_v60, %v195_v51  ;;  %v266_v42 = vld [vmem:[#allocation6 + $0x10] sm:$0xff]  ;;  %v81_v45 = vld [vmem:[#allocation3 + $0x58] sm:$0xff]  ;;  %v265_v53 = vld [vmem:[#allocation6 + $0x8] sm:$0xff] }
  0x1e   :  { %v171_v10 = vadd.f32 %v170_v62, %v169_v52  ;;  %v191_v11 = vrot.slane %v190_v63, 1  ;;  %v204_v12 = vadd.f32 %v203_v0, %v202_v54  ;;  %v211_v13 = vadd.f32 %v210_v1, %v209_v55  ;;  %v80_v44 = vld [vmem:[#allocation3 + $0x50] sm:$0xff]  ;;  %385 = vmatpush.msra.mxu3 %v317_v30  ;;  %324 = vmatpush.msra.mxu1 %v317_v30  ;;  %v82_v55 = vld [vmem:[#allocation3 + $0x60] sm:$0xff]  ;;  %v85_v62 = vld [vmem:[#allocation3 + $0x78] sm:$0xff] }
  0x1f   :  { %374 = vmatpush.msra.mxu2 %v271_v47  ;;  %288 = vmatpush.msra.mxu0 %v271_v47  ;;  %v178_v19 = vadd.f32 %v177_v7, %v176_v58  ;;  %v185_v20 = vadd.f32 %v184_v8, %v183_v59  ;;  %v198_v21 = vrot.slane %v197_v9, 1  ;;  %v102_v23 = vadd.f32 %v71_v3, %v70_v2  ;;  %v315_v52 = vld [vmem:[#allocation8 + $0x50] sm:$0xff]  ;;  %v314_v2 = vld [vmem:[#allocation8 + $0x48] sm:$0xff]  ;;  %v264_v3 = vld [vmem:[#allocation6] sm:$0xff] }
  0x20   :  { %v192_v24 = vadd.f32 %v191_v11, %v190_v63  ;;  %v205_v25 = vrot.slane %v204_v12, 1  ;;  %v212_v26 = vrot.slane %v211_v13, 1  ;;  %v244_v27 = vsel %vm230_vm0, %v171_v10, %v164_v6  ;;  %386 = vmatpush.msra.mxu3 %v316_v41  ;;  %325 = vmatpush.msra.mxu1 %v316_v41  ;;  %v84_v61 = vld [vmem:[#allocation3 + $0x70] sm:$0xff] }
  0x21   :  { %375 = vmatpush.msra.mxu2 %v270_v56  ;;  %289 = vmatpush.msra.mxu0 %v270_v56  ;;  %v199_v31 = vadd.f32 %v198_v21, %v197_v9  ;;  %v245_v32 = vsel %vm232_vm1, %v178_v19, %v244_v27  ;;  %v103_v36 = vrot.slane %v102_v23, 4  ;;  %v109_v37 = vadd.f32 %v73_v15, %v72_v14  ;;  %v83_v56 = vld [vmem:[#allocation3 + $0x68] sm:$0xff]  ;;  %v312_v21 = vld [vmem:[#allocation8 + $0x38] sm:$0xff]  ;;  %v311_v30 = vld [vmem:[#allocation8 + $0x30] sm:$0xff] }
  0x22   :  { %v206_v38 = vadd.f32 %v205_v25, %v204_v12  ;;  %v213_v39 = vadd.f32 %v212_v26, %v211_v13  ;;  %v246_v40 = vsel %vm234_vm2, %v185_v20, %v245_v32  ;;  %v116_v48 = vadd.f32 %v75_v28, %v74_v22  ;;  %387 = vmatpush.msra.mxu3 %v315_v52  ;;  %v313_v12 = vld [vmem:[#allocation8 + $0x40] sm:$0xff] }
  0x23   :  { %376 = vmatpush.msra.mxu2 %v269_v5  ;;  %290 = vmatpush.msra.mxu0 %v269_v5  ;;  %v247_v43 = vsel %vm236_vm3, %v192_v24, %v246_v40  ;;  %v104_v46 = vadd.f32 %v103_v36, %v102_v23  ;;  %v110_v47 = vrot.slane %v109_v37, 4  ;;  %v123_v50 = vadd.f32 %v77_v33, %v76_v29 }
  0x24   :  { %v248_v49 = vsel %vm238_vm4, %v199_v31, %v247_v43  ;;  %v130_v51 = vadd.f32 %v79_v35, %v78_v34  ;;  %v117_v59 = vrot.slane %v116_v48, 4  ;;  %v137_v1 = vadd.f32 %v81_v45, %v80_v44  ;;  %326 = vmatpush.msra.mxu1 %v315_v52  ;;  %388 = vmatpush.msra.mxu3 %v314_v2  ;;  %v308_v52 = vld [vmem:[#allocation8 + $0x18] sm:$0xff] }
  0x25   :  { %377 = vmatpush.msra.mxu2 %v268_v17  ;;  %291 = vmatpush.msra.mxu0 %v268_v17  ;;  %v249_v54 = vsel %vm240_vm5, %v206_v38, %v248_v49  ;;  %v105_v57 = vrot.slane %v104_v46, 2  ;;  %v111_v58 = vadd.f32 %v110_v47, %v109_v37  ;;  %v124_v63 = vrot.slane %v123_v50, 4  ;;  %v310_v38 = vld [vmem:[#allocation8 + $0x28] sm:$0xff] }
  0x26   :  { %v250_v60 = vsel %vm242_vm6, %v213_v39, %v249_v54  ;;  %v131_v0 = vrot.slane %v130_v51, 4  ;;  %v118_v7 = vadd.f32 %v117_v59, %v116_v48  ;;  %v138_v10 = vrot.slane %v137_v1, 4  ;;  %327 = vmatpush.msra.mxu1 %v314_v2  ;;  %389 = vmatpush.msra.mxu3 %v313_v12 }
  0x27   :  { %378 = vmatpush.msra.mxu2 %v267_v18  ;;  %292 = vmatpush.msra.mxu0 %v267_v18  ;;  %v263_v4 = vmul.f32 0.015625, %v250_v60  ;;  %v106_v5 = vadd.f32 %v105_v57, %v104_v46  ;;  %v112_v6 = vrot.slane %v111_v58, 2  ;;  %v125_v8 = vadd.f32 %v124_v63, %v123_v50  ;;  %v309_v46 = vld [vmem:[#allocation8 + $0x20] sm:$0xff]  ;;  %v307_v57 = vld [vmem:[#allocation8 + $0x10] sm:$0xff] }
  0x28   :  { %v132_v9 = vadd.f32 %v131_v0, %v130_v51  ;;  %v144_v11 = vadd.f32 %v83_v56, %v82_v55  ;;  %v119_v15 = vrot.slane %v118_v7, 2  ;;  %v151_v16 = vadd.f32 %v85_v62, %v84_v61  ;;  %328 = vmatpush.msra.mxu1 %v313_v12  ;;  %390 = vmatpush.msra.mxu3 %v312_v21  ;;  %v306_v62 = vld [vmem:[#allocation8 + $0x8] sm:$0xff]  ;;  %v305_v63 = vld [vmem:[#allocation8] sm:$0xff] }
  0x29   :  { %379 = vmatpush.msra.mxu2 %v266_v42  ;;  %293 = vmatpush.msra.mxu0 %v266_v42  ;;  %v107_v13 = vrot.slane %v106_v5, 1  ;;  %v113_v14 = vadd.f32 %v112_v6, %v111_v58  ;;  %v126_v17 = vrot.slane %v125_v8, 2  ;;  %v139_v19 = vadd.f32 %v138_v10, %v137_v1 }
  0x2a   :  { %v133_v18 = vrot.slane %v132_v9, 2  ;;  %v145_v20 = vrot.slane %v144_v11, 4  ;;  %v120_v24 = vadd.f32 %v119_v15, %v118_v7  ;;  %v152_v25 = vrot.slane %v151_v16, 4  ;;  %329 = vmatpush.msra.mxu1 %v312_v21  ;;  %391 = vmatpush.msra.mxu3 %v311_v30 }
  0x2b   :  { %380 = vmatpush.msra.mxu2 %v265_v53  ;;  %294 = vmatpush.msra.mxu0 %v265_v53  ;;  %v108_v22 = vadd.f32 %v107_v13, %v106_v5  ;;  %v114_v23 = vrot.slane %v113_v14, 1  ;;  %v127_v26 = vadd.f32 %v126_v17, %v125_v8  ;;  %v140_v28 = vrot.slane %v139_v19, 2 }
  0x2c   :  { %v134_v27 = vadd.f32 %v133_v18, %v132_v9  ;;  %v146_v29 = vadd.f32 %v145_v20, %v144_v11  ;;  %v121_v32 = vrot.slane %v120_v24, 1  ;;  %v153_v33 = vadd.f32 %v152_v25, %v151_v16  ;;  %330 = vmatpush.msra.mxu1 %v311_v30  ;;  %392 = vmatpush.msra.mxu3 %v310_v38 }
  0x2d   :  { %381 = vmatpush.msra.mxu2 %v264_v3  ;;  %295 = vmatpush.msra.mxu0 %v264_v3  ;;  %v115_v31 = vadd.f32 %v114_v23, %v113_v14  ;;  %v128_v34 = vrot.slane %v127_v26, 1  ;;  %v141_v36 = vadd.f32 %v140_v28, %v139_v19 }
  0x2e   :  { %299 = vmatmul.f32.vlgmr.msra.gmra.mxu2 %v263_v4  ;;  %v135_v35 = vrot.slane %v134_v27, 1  ;;  %v147_v37 = vrot.slane %v146_v29, 2  ;;  %v122_v39 = vadd.f32 %v121_v32, %v120_v24  ;;  %v154_v40 = vrot.slane %v153_v33, 2  ;;  %331 = vmatpush.msra.mxu1 %v310_v38 }
  0x2f   :  { %v231_v41 = vsel %vm230_vm0, %v115_v31, %v108_v22  ;;  %v129_v42 = vadd.f32 %v128_v34, %v127_v26  ;;  %v142_v44 = vrot.slane %v141_v36, 1  ;;  %393 = vmatpush.msra.mxu3 %v309_v46 }
  0x30   :  { %v136_v43 = vadd.f32 %v135_v35, %v134_v27  ;;  %v148_v45 = vadd.f32 %v147_v37, %v146_v29  ;;  %v155_v47 = vadd.f32 %v154_v40, %v153_v33  ;;  %v233_v48 = vsel %vm232_vm1, %v122_v39, %v231_v41  ;;  %332 = vmatpush.msra.mxu1 %v309_v46 }
  0x31   :  { %v143_v49 = vadd.f32 %v142_v44, %v141_v36  ;;  %v235_v51 = vsel %vm234_vm2, %v129_v42, %v233_v48  ;;  %394 = vmatpush.msra.mxu3 %v308_v52 }
  0x32   :  { %v149_v50 = vrot.slane %v148_v45, 1  ;;  %v156_v53 = vrot.slane %v155_v47, 1  ;;  %v237_v54 = vsel %vm236_vm3, %v136_v43, %v235_v51  ;;  %333 = vmatpush.msra.mxu1 %v308_v52 }
  0x33   :  { %v239_v56 = vsel %vm238_vm4, %v143_v49, %v237_v54  ;;  %395 = vmatpush.msra.mxu3 %v307_v57 }
  0x34   :  { %v150_v55 = vadd.f32 %v149_v50, %v148_v45  ;;  %v157_v58 = vadd.f32 %v156_v53, %v155_v47  ;;  %334 = vmatpush.msra.mxu1 %v307_v57 }
  0x35   :  { %396 = vmatpush.msra.mxu3 %v306_v62 }
  0x36   :  { %v241_v59 = vsel %vm240_vm5, %v150_v55, %v239_v56  ;;  %335 = vmatpush.msra.mxu1 %v306_v62 }
  0x37   :  { %v243_v60 = vsel %vm242_vm6, %v157_v58, %v241_v59  ;;  %397 = vmatpush.msra.mxu3 %v305_v63 }
  0x38   :  { %v262_v61 = vmul.f32 0.015625, %v243_v60  ;;  %336 = vmatpush.msra.mxu1 %v305_v63 }
  0x3a   :  { %296 = vmatmul.f32.vlgmr.msra.gmra.mxu0 %v262_v61 }
  0xb1   :  { %v300_v0 = vpop.f32.mrf.mxu2 }
  0xb2   :  { %v304_v1 = vmax.f32 %v300_v0, 0.0 }
  0xb4   :  { %340 = vmatmul.f32.vlgmr.msra.gmra.mxu3 %v304_v1 }
  0xb7   :  { %v297_v2 = vpop.f32.mrf.mxu0 }
  0xb8   :  { %v303_v3 = vmax.f32 %v297_v2, 0.0 }
  0xba   :  { %337 = vmatmul.f32.vlgmr.msra.gmra.mxu1 %v303_v3 }
 0x137   :  { %v341_v4 = vpop.f32.mrf.mxu3  ;;  %v338_v5 = vpop.f32.mrf.mxu1 }
 0x138   :  { %345 = vst [vmem:[#allocation9 + $0x8] sm:$0xff] %v341_v4 }
 0x139   :  { %344 = vst [vmem:[#allocation9] sm:$0xff] %v338_v5 }
 0x13a   :  { %358 = dma.vmem_to_hbm [thread:$0]  %s351_s27, 256, %s353_s30, [#allocation5], %s507_s20, %s507_s20, %s508_s21  }
 0x13b   :  { %504 = dma.done.wait [#allocation5], 256  }
 0x13c   :  { %505 = vsyncadd [#allocation5], 4294967040 }
 0x13d   :  { %363 = vsyncpa [#allocation4], 1 }
 0x13e   :  { %364 = vsyncpa [#allocation7], 1 }
 0x13f   :  { %365 = vsyncpa [#allocation5], 1 }

</bundles_post_ra>
